<compile_context>
chip_gen: v5e
topology: v5e:2x2
jax: 0.10.0
libtpu: 0.0.40
codegen_flags: <defaults>
</compile_context>

<pallas_src>
import functools
import math

import jax
import jax.numpy as jnp
from jax import lax
from jax.experimental import pallas as pl
from jax.experimental.pallas import tpu as pltpu

# ---- config (small, consistent with the module) ----
BATCH = 2
SEQ = 8
HIDDEN = 32
NUM_HEADS = 4
HEAD_SIZE = HIDDEN // NUM_HEADS
LAYER_NORM_EPS = 1e-12


def bert_attention_kernel(x_ref, w_ref, b_ref, gamma_ref, beta_ref, o_ref, ctx_ref,
                          *, batch, seq, hidden, num_heads):
    """Fused multi-head self-attention + residual-project + ReLU + LayerNorm for
    the whole (B*S, H) slab in one invocation.

    x_ref:     (B*S, H)       hidden_states, flattened over batch*seq
    w_ref:     (H, 4H)        [W_q/sqrt(hd) | W_k | W_v | W_proj]
    b_ref:     (1, 4H)        [b_q/sqrt(hd) | b_k | b_v | 0]
    gamma_ref: (1, H), beta_ref: (1, H)  LayerNorm affine params
    o_ref:     (B*S, H)       output
    ctx_ref:   (B*S, H)       VMEM scratch holding the merged per-head contexts
    """
    head = hidden // num_heads
    x = x_ref[...]                                            # (B*S, H)

    # Single fused projection: one MXU push whose output is exactly 128 lanes.
    proj = jnp.dot(x, w_ref[...], preferred_element_type=jnp.float32) + b_ref[...]

    # Per-(batch, head) attention on resident VMEM tiles.
    for b in range(batch):
        r0 = b * seq
        for h in range(num_heads):
            c0 = h * head
            qh = proj[r0:r0 + seq, c0:c0 + head]                              # pre-scaled q
            kh = proj[r0:r0 + seq, hidden + c0:hidden + c0 + head]
            vh = proj[r0:r0 + seq, 2 * hidden + c0:2 * hidden + c0 + head]

            # q @ k^T without an explicit transpose: contract the last dims.
            scores = lax.dot_general(qh, kh, (((1,), (1,)), ((), ())),
                                     preferred_element_type=jnp.float32)      # (S, S)
            scores = scores - jnp.max(scores, axis=-1, keepdims=True)
            p = jnp.exp(scores)
            # EUP approx reciprocal instead of a VALU divide.
            p = p * pl.reciprocal(jnp.sum(p, axis=-1, keepdims=True), approx=True)

            # Write this head's context directly into its column slice (no concat).
            ctx_ref[pl.ds(r0, seq), pl.ds(c0, head)] = jnp.dot(
                p, vh, preferred_element_type=jnp.float32)

    # Residual projection (bias-free columns of the fused matmul), add, ReLU.
    res = proj[:, 3 * hidden:4 * hidden]                      # (B*S, H)
    ctx = jnp.maximum(ctx_ref[...] + res, 0.0)

    # LayerNorm over the hidden dim.
    mean = jnp.mean(ctx, axis=-1, keepdims=True)
    var = jnp.mean((ctx - mean) ** 2, axis=-1, keepdims=True)
    normed = (ctx - mean) * lax.rsqrt(var + LAYER_NORM_EPS)
    o_ref[...] = normed * gamma_ref[...] + beta_ref[...]


def pack_params(wq, bq, wk, bk, wv, bv, wp):
    """One-time host-side fusion of the four projections into (H, 4H) / (1, 4H).
    Folds the 1/sqrt(head_size) attention scale into the W_q / b_q columns."""
    scale = 1.0 / math.sqrt(HEAD_SIZE)
    w_fused = jnp.concatenate([wq * scale, wk, wv, wp], axis=1)               # (H, 4H)
    b_fused = jnp.concatenate(
        [bq * scale, bk, bv, jnp.zeros((HIDDEN,), jnp.float32)]).reshape(1, 4 * HIDDEN)
    return w_fused, b_fused


@jax.jit
def bert_attention(x, w_fused, b_fused, gamma, beta):
    B, S, H = x.shape
    kernel = functools.partial(bert_attention_kernel,
                               batch=B, seq=S, hidden=H, num_heads=NUM_HEADS)
    vmem = pl.BlockSpec(memory_space=pltpu.MemorySpace.VMEM)   # full array, resident in VMEM
    out2d = pl.pallas_call(
        kernel,
        out_shape=jax.ShapeDtypeStruct((B * S, H), jnp.float32),
        in_specs=[vmem, vmem, vmem, vmem, vmem],
        out_specs=vmem,
        scratch_shapes=[pltpu.VMEM((B * S, H), jnp.float32)],
    )(x.reshape(B * S, H), w_fused, b_fused, gamma.reshape(1, H), beta.reshape(1, H))
    return out2d.reshape(B, S, H)


def reference(x, wq, bq, wk, bk, wv, bv, wp, gamma, beta):
    """Pure-JAX reference mirroring the PyTorch forward (eval mode)."""
    B, S, H = x.shape
    q = x @ wq + bq
    k = x @ wk + bk
    v = x @ wv + bv

    def split(t):  # (B,S,H) -> (B,nh,S,hd)
        return t.reshape(B, S, NUM_HEADS, HEAD_SIZE).transpose(0, 2, 1, 3)

    qh, kh, vh = split(q), split(k), split(v)
    scores = jnp.einsum("bhqd,bhkd->bhqk", qh, kh) / math.sqrt(HEAD_SIZE)
    probs = jax.nn.softmax(scores, axis=-1)
    ctx = jnp.einsum("bhqk,bhkd->bhqd", probs, vh)
    ctx = ctx.transpose(0, 2, 1, 3).reshape(B, S, H)
    ctx = jax.nn.relu(ctx + x @ wp)
    mean = jnp.mean(ctx, axis=-1, keepdims=True)
    var = jnp.mean((ctx - mean) ** 2, axis=-1, keepdims=True)
    return (ctx - mean) * jax.lax.rsqrt(var + LAYER_NORM_EPS) * gamma + beta


if __name__ == "__main__":
    key = jax.random.PRNGKey(0)
    keys = jax.random.split(key, 8)

    x = jax.random.normal(keys[0], (BATCH, SEQ, HIDDEN), dtype=jnp.float32)

    # Deterministic parameter init. PyTorch nn.Linear computes x @ W.T + b;
    # we store the weights directly in "x @ W" orientation ((in, out)).
    s = 1.0 / math.sqrt(HIDDEN)
    wq = jax.random.uniform(keys[1], (HIDDEN, HIDDEN), jnp.float32, -s, s)
    wk = jax.random.uniform(keys[2], (HIDDEN, HIDDEN), jnp.float32, -s, s)
    wv = jax.random.uniform(keys[3], (HIDDEN, HIDDEN), jnp.float32, -s, s)
    wp = jax.random.uniform(keys[4], (HIDDEN, HIDDEN), jnp.float32, -s, s)
    bq = jax.random.uniform(keys[5], (HIDDEN,), jnp.float32, -s, s)
    bk = jax.random.uniform(keys[6], (HIDDEN,), jnp.float32, -s, s)
    bv = jax.random.uniform(keys[7], (HIDDEN,), jnp.float32, -s, s)
    gamma = jnp.ones((HIDDEN,), jnp.float32)   # nn.LayerNorm default init
    beta = jnp.zeros((HIDDEN,), jnp.float32)

    w_fused, b_fused = pack_params(wq, bq, wk, bk, wv, bv, wp)

    out = bert_attention(x, w_fused, b_fused, gamma, beta)
    out = jax.block_until_ready(out)

    ref = reference(x, wq, bq, wk, bk, wv, bv, wp, gamma, beta)
    assert out.shape == (BATCH, SEQ, HIDDEN)
    # Tolerance slightly loosened (vs 1e-5) because the softmax denominator uses
    # the EUP approximate reciprocal, as recommended by the perf review.
    assert jnp.allclose(out, ref, atol=2e-3, rtol=2e-3), "mismatch vs JAX reference"

    print("KERNEL_OK")
</pallas_src>

<mosaic_0001>
module attributes {stable_mosaic.version = 11 : i64} {
  func.func @bert_attention_kernel(%arg0: memref<16x32xf32, #tpu.memory_space<vmem>>, %arg1: memref<32x128xf32, #tpu.memory_space<vmem>>, %arg2: memref<1x128xf32, #tpu.memory_space<vmem>>, %arg3: memref<1x32xf32, #tpu.memory_space<vmem>>, %arg4: memref<1x32xf32, #tpu.memory_space<vmem>>, %arg5: memref<16x32xf32, #tpu.memory_space<vmem>>, %arg6: memref<16x32xf32, #tpu.memory_space<vmem>>) attributes {dimension_semantics = [], scalar_prefetch = 0 : i64, scratch_operands = 1 : i64, tpu.core_type = #tpu.core_type<tc>} {
    %c0 = arith.constant 0 : index
    %c0_0 = arith.constant 0 : index
    %0 = vector.load %arg0[%c0, %c0_0] : memref<16x32xf32, #tpu.memory_space<vmem>>, vector<16x32xf32>
    %c0_1 = arith.constant 0 : index
    %c0_2 = arith.constant 0 : index
    %1 = vector.load %arg1[%c0_1, %c0_2] : memref<32x128xf32, #tpu.memory_space<vmem>>, vector<32x128xf32>
    %cst = arith.constant dense<0.000000e+00> : vector<16x128xf32>
    %2 = tpu.matmul %0, %1, %cst {dimension_numbers = #tpu.dot_dimension_numbers<[1], [0], [0], [1], [0, 0, 1, 1], [], []>} : vector<16x32xf32>, vector<32x128xf32>, vector<16x128xf32> -> vector<16x128xf32>
    %c0_3 = arith.constant 0 : index
    %c0_4 = arith.constant 0 : index
    %3 = vector.load %arg2[%c0_3, %c0_4] : memref<1x128xf32, #tpu.memory_space<vmem>>, vector<1x128xf32>
    %4 = vector.broadcast %3 : vector<1x128xf32> to vector<16x128xf32>
    %5 = arith.addf %2, %4 : vector<16x128xf32>
    %6 = vector.extract_strided_slice %5 {offsets = [0, 0], sizes = [8, 8], strides = [1, 1]} : vector<16x128xf32> to vector<8x8xf32>
    %7 = vector.extract_strided_slice %5 {offsets = [0, 32], sizes = [8, 8], strides = [1, 1]} : vector<16x128xf32> to vector<8x8xf32>
    %8 = vector.extract_strided_slice %5 {offsets = [0, 64], sizes = [8, 8], strides = [1, 1]} : vector<16x128xf32> to vector<8x8xf32>
    %cst_5 = arith.constant dense<0.000000e+00> : vector<8x8xf32>
    %9 = tpu.matmul %6, %7, %cst_5 {dimension_numbers = #tpu.dot_dimension_numbers<[1], [1], [0], [0], [0, 0, 1, 0], [], []>} : vector<8x8xf32>, vector<8x8xf32>, vector<8x8xf32> -> vector<8x8xf32>
    %cst_6 = arith.constant dense<0xFF800000> : vector<8xf32>
    %10 = vector.multi_reduction <maximumf>, %9, %cst_6 [1] : vector<8x8xf32> to vector<8xf32>
    %11 = vector.shape_cast %10 : vector<8xf32> to vector<8x1xf32>
    %12 = vector.broadcast %11 : vector<8x1xf32> to vector<8x8xf32>
    %13 = arith.subf %9, %12 : vector<8x8xf32>
    %14 = math.exp %13 : vector<8x8xf32>
    %cst_7 = arith.constant dense<0.000000e+00> : vector<8xf32>
    %15 = vector.multi_reduction <add>, %14, %cst_7 [1] : vector<8x8xf32> to vector<8xf32>
    %16 = vector.shape_cast %15 : vector<8xf32> to vector<8x1xf32>
    %17 = tpu.reciprocal %16 {approx = true} : vector<8x1xf32> -> vector<8x1xf32>
    %18 = vector.broadcast %17 : vector<8x1xf32> to vector<8x8xf32>
    %19 = arith.mulf %14, %18 : vector<8x8xf32>
    %cst_8 = arith.constant dense<0.000000e+00> : vector<8x8xf32>
    %20 = tpu.matmul %19, %8, %cst_8 {dimension_numbers = #tpu.dot_dimension_numbers<[1], [0], [0], [1], [0, 0, 1, 1], [], []>} : vector<8x8xf32>, vector<8x8xf32>, vector<8x8xf32> -> vector<8x8xf32>
    %c0_9 = arith.constant 0 : index
    %c0_10 = arith.constant 0 : index
    %21 = vector.load %arg6[%c0_9, %c0_10] : memref<16x32xf32, #tpu.memory_space<vmem>>, vector<8x8xf32>
    tpu.vector_store %arg6[%c0_9, %c0_10], %20 {strides = array<i32>} : memref<16x32xf32, #tpu.memory_space<vmem>>, vector<8x8xf32>,
    %22 = vector.extract_strided_slice %5 {offsets = [0, 8], sizes = [8, 8], strides = [1, 1]} : vector<16x128xf32> to vector<8x8xf32>
    %23 = vector.extract_strided_slice %5 {offsets = [0, 40], sizes = [8, 8], strides = [1, 1]} : vector<16x128xf32> to vector<8x8xf32>
    %24 = vector.extract_strided_slice %5 {offsets = [0, 72], sizes = [8, 8], strides = [1, 1]} : vector<16x128xf32> to vector<8x8xf32>
    %cst_11 = arith.constant dense<0.000000e+00> : vector<8x8xf32>
    %25 = tpu.matmul %22, %23, %cst_11 {dimension_numbers = #tpu.dot_dimension_numbers<[1], [1], [0], [0], [0, 0, 1, 0], [], []>} : vector<8x8xf32>, vector<8x8xf32>, vector<8x8xf32> -> vector<8x8xf32>
    %cst_12 = arith.constant dense<0xFF800000> : vector<8xf32>
    %26 = vector.multi_reduction <maximumf>, %25, %cst_12 [1] : vector<8x8xf32> to vector<8xf32>
    %27 = vector.shape_cast %26 : vector<8xf32> to vector<8x1xf32>
    %28 = vector.broadcast %27 : vector<8x1xf32> to vector<8x8xf32>
    %29 = arith.subf %25, %28 : vector<8x8xf32>
    %30 = math.exp %29 : vector<8x8xf32>
    %cst_13 = arith.constant dense<0.000000e+00> : vector<8xf32>
    %31 = vector.multi_reduction <add>, %30, %cst_13 [1] : vector<8x8xf32> to vector<8xf32>
    %32 = vector.shape_cast %31 : vector<8xf32> to vector<8x1xf32>
    %33 = tpu.reciprocal %32 {approx = true} : vector<8x1xf32> -> vector<8x1xf32>
    %34 = vector.broadcast %33 : vector<8x1xf32> to vector<8x8xf32>
    %35 = arith.mulf %30, %34 : vector<8x8xf32>
    %cst_14 = arith.constant dense<0.000000e+00> : vector<8x8xf32>
    %36 = tpu.matmul %35, %24, %cst_14 {dimension_numbers = #tpu.dot_dimension_numbers<[1], [0], [0], [1], [0, 0, 1, 1], [], []>} : vector<8x8xf32>, vector<8x8xf32>, vector<8x8xf32> -> vector<8x8xf32>
    %c0_15 = arith.constant 0 : index
    %c8 = arith.constant 8 : index
    %37 = vector.load %arg6[%c0_15, %c8] : memref<16x32xf32, #tpu.memory_space<vmem>>, vector<8x8xf32>
    tpu.vector_store %arg6[%c0_15, %c8], %36 {strides = array<i32>} : memref<16x32xf32, #tpu.memory_space<vmem>>, vector<8x8xf32>,
    %38 = vector.extract_strided_slice %5 {offsets = [0, 16], sizes = [8, 8], strides = [1, 1]} : vector<16x128xf32> to vector<8x8xf32>
    %39 = vector.extract_strided_slice %5 {offsets = [0, 48], sizes = [8, 8], strides = [1, 1]} : vector<16x128xf32> to vector<8x8xf32>
    %40 = vector.extract_strided_slice %5 {offsets = [0, 80], sizes = [8, 8], strides = [1, 1]} : vector<16x128xf32> to vector<8x8xf32>
    %cst_16 = arith.constant dense<0.000000e+00> : vector<8x8xf32>
    %41 = tpu.matmul %38, %39, %cst_16 {dimension_numbers = #tpu.dot_dimension_numbers<[1], [1], [0], [0], [0, 0, 1, 0], [], []>} : vector<8x8xf32>, vector<8x8xf32>, vector<8x8xf32> -> vector<8x8xf32>
    %cst_17 = arith.constant dense<0xFF800000> : vector<8xf32>
    %42 = vector.multi_reduction <maximumf>, %41, %cst_17 [1] : vector<8x8xf32> to vector<8xf32>
    %43 = vector.shape_cast %42 : vector<8xf32> to vector<8x1xf32>
    %44 = vector.broadcast %43 : vector<8x1xf32> to vector<8x8xf32>
    %45 = arith.subf %41, %44 : vector<8x8xf32>
    %46 = math.exp %45 : vector<8x8xf32>
    %cst_18 = arith.constant dense<0.000000e+00> : vector<8xf32>
    %47 = vector.multi_reduction <add>, %46, %cst_18 [1] : vector<8x8xf32> to vector<8xf32>
    %48 = vector.shape_cast %47 : vector<8xf32> to vector<8x1xf32>
    %49 = tpu.reciprocal %48 {approx = true} : vector<8x1xf32> -> vector<8x1xf32>
    %50 = vector.broadcast %49 : vector<8x1xf32> to vector<8x8xf32>
    %51 = arith.mulf %46, %50 : vector<8x8xf32>
    %cst_19 = arith.constant dense<0.000000e+00> : vector<8x8xf32>
    %52 = tpu.matmul %51, %40, %cst_19 {dimension_numbers = #tpu.dot_dimension_numbers<[1], [0], [0], [1], [0, 0, 1, 1], [], []>} : vector<8x8xf32>, vector<8x8xf32>, vector<8x8xf32> -> vector<8x8xf32>
    %c0_20 = arith.constant 0 : index
    %c16 = arith.constant 16 : index
    %53 = vector.load %arg6[%c0_20, %c16] : memref<16x32xf32, #tpu.memory_space<vmem>>, vector<8x8xf32>
    tpu.vector_store %arg6[%c0_20, %c16], %52 {strides = array<i32>} : memref<16x32xf32, #tpu.memory_space<vmem>>, vector<8x8xf32>,
    %54 = vector.extract_strided_slice %5 {offsets = [0, 24], sizes = [8, 8], strides = [1, 1]} : vector<16x128xf32> to vector<8x8xf32>
    %55 = vector.extract_strided_slice %5 {offsets = [0, 56], sizes = [8, 8], strides = [1, 1]} : vector<16x128xf32> to vector<8x8xf32>
    %56 = vector.extract_strided_slice %5 {offsets = [0, 88], sizes = [8, 8], strides = [1, 1]} : vector<16x128xf32> to vector<8x8xf32>
    %cst_21 = arith.constant dense<0.000000e+00> : vector<8x8xf32>
    %57 = tpu.matmul %54, %55, %cst_21 {dimension_numbers = #tpu.dot_dimension_numbers<[1], [1], [0], [0], [0, 0, 1, 0], [], []>} : vector<8x8xf32>, vector<8x8xf32>, vector<8x8xf32> -> vector<8x8xf32>
    %cst_22 = arith.constant dense<0xFF800000> : vector<8xf32>
    %58 = vector.multi_reduction <maximumf>, %57, %cst_22 [1] : vector<8x8xf32> to vector<8xf32>
    %59 = vector.shape_cast %58 : vector<8xf32> to vector<8x1xf32>
    %60 = vector.broadcast %59 : vector<8x1xf32> to vector<8x8xf32>
    %61 = arith.subf %57, %60 : vector<8x8xf32>
    %62 = math.exp %61 : vector<8x8xf32>
    %cst_23 = arith.constant dense<0.000000e+00> : vector<8xf32>
    %63 = vector.multi_reduction <add>, %62, %cst_23 [1] : vector<8x8xf32> to vector<8xf32>
    %64 = vector.shape_cast %63 : vector<8xf32> to vector<8x1xf32>
    %65 = tpu.reciprocal %64 {approx = true} : vector<8x1xf32> -> vector<8x1xf32>
    %66 = vector.broadcast %65 : vector<8x1xf32> to vector<8x8xf32>
    %67 = arith.mulf %62, %66 : vector<8x8xf32>
    %cst_24 = arith.constant dense<0.000000e+00> : vector<8x8xf32>
    %68 = tpu.matmul %67, %56, %cst_24 {dimension_numbers = #tpu.dot_dimension_numbers<[1], [0], [0], [1], [0, 0, 1, 1], [], []>} : vector<8x8xf32>, vector<8x8xf32>, vector<8x8xf32> -> vector<8x8xf32>
    %c0_25 = arith.constant 0 : index
    %c24 = arith.constant 24 : index
    %69 = vector.load %arg6[%c0_25, %c24] : memref<16x32xf32, #tpu.memory_space<vmem>>, vector<8x8xf32>
    tpu.vector_store %arg6[%c0_25, %c24], %68 {strides = array<i32>} : memref<16x32xf32, #tpu.memory_space<vmem>>, vector<8x8xf32>,
    %70 = vector.extract_strided_slice %5 {offsets = [8, 0], sizes = [8, 8], strides = [1, 1]} : vector<16x128xf32> to vector<8x8xf32>
    %71 = vector.extract_strided_slice %5 {offsets = [8, 32], sizes = [8, 8], strides = [1, 1]} : vector<16x128xf32> to vector<8x8xf32>
    %72 = vector.extract_strided_slice %5 {offsets = [8, 64], sizes = [8, 8], strides = [1, 1]} : vector<16x128xf32> to vector<8x8xf32>
    %cst_26 = arith.constant dense<0.000000e+00> : vector<8x8xf32>
    %73 = tpu.matmul %70, %71, %cst_26 {dimension_numbers = #tpu.dot_dimension_numbers<[1], [1], [0], [0], [0, 0, 1, 0], [], []>} : vector<8x8xf32>, vector<8x8xf32>, vector<8x8xf32> -> vector<8x8xf32>
    %cst_27 = arith.constant dense<0xFF800000> : vector<8xf32>
    %74 = vector.multi_reduction <maximumf>, %73, %cst_27 [1] : vector<8x8xf32> to vector<8xf32>
    %75 = vector.shape_cast %74 : vector<8xf32> to vector<8x1xf32>
    %76 = vector.broadcast %75 : vector<8x1xf32> to vector<8x8xf32>
    %77 = arith.subf %73, %76 : vector<8x8xf32>
    %78 = math.exp %77 : vector<8x8xf32>
    %cst_28 = arith.constant dense<0.000000e+00> : vector<8xf32>
    %79 = vector.multi_reduction <add>, %78, %cst_28 [1] : vector<8x8xf32> to vector<8xf32>
    %80 = vector.shape_cast %79 : vector<8xf32> to vector<8x1xf32>
    %81 = tpu.reciprocal %80 {approx = true} : vector<8x1xf32> -> vector<8x1xf32>
    %82 = vector.broadcast %81 : vector<8x1xf32> to vector<8x8xf32>
    %83 = arith.mulf %78, %82 : vector<8x8xf32>
    %cst_29 = arith.constant dense<0.000000e+00> : vector<8x8xf32>
    %84 = tpu.matmul %83, %72, %cst_29 {dimension_numbers = #tpu.dot_dimension_numbers<[1], [0], [0], [1], [0, 0, 1, 1], [], []>} : vector<8x8xf32>, vector<8x8xf32>, vector<8x8xf32> -> vector<8x8xf32>
    %c8_30 = arith.constant 8 : index
    %c0_31 = arith.constant 0 : index
    %85 = vector.load %arg6[%c8_30, %c0_31] : memref<16x32xf32, #tpu.memory_space<vmem>>, vector<8x8xf32>
    tpu.vector_store %arg6[%c8_30, %c0_31], %84 {strides = array<i32>} : memref<16x32xf32, #tpu.memory_space<vmem>>, vector<8x8xf32>,
    %86 = vector.extract_strided_slice %5 {offsets = [8, 8], sizes = [8, 8], strides = [1, 1]} : vector<16x128xf32> to vector<8x8xf32>
    %87 = vector.extract_strided_slice %5 {offsets = [8, 40], sizes = [8, 8], strides = [1, 1]} : vector<16x128xf32> to vector<8x8xf32>
    %88 = vector.extract_strided_slice %5 {offsets = [8, 72], sizes = [8, 8], strides = [1, 1]} : vector<16x128xf32> to vector<8x8xf32>
    %cst_32 = arith.constant dense<0.000000e+00> : vector<8x8xf32>
    %89 = tpu.matmul %86, %87, %cst_32 {dimension_numbers = #tpu.dot_dimension_numbers<[1], [1], [0], [0], [0, 0, 1, 0], [], []>} : vector<8x8xf32>, vector<8x8xf32>, vector<8x8xf32> -> vector<8x8xf32>
    %cst_33 = arith.constant dense<0xFF800000> : vector<8xf32>
    %90 = vector.multi_reduction <maximumf>, %89, %cst_33 [1] : vector<8x8xf32> to vector<8xf32>
    %91 = vector.shape_cast %90 : vector<8xf32> to vector<8x1xf32>
    %92 = vector.broadcast %91 : vector<8x1xf32> to vector<8x8xf32>
    %93 = arith.subf %89, %92 : vector<8x8xf32>
    %94 = math.exp %93 : vector<8x8xf32>
    %cst_34 = arith.constant dense<0.000000e+00> : vector<8xf32>
    %95 = vector.multi_reduction <add>, %94, %cst_34 [1] : vector<8x8xf32> to vector<8xf32>
    %96 = vector.shape_cast %95 : vector<8xf32> to vector<8x1xf32>
    %97 = tpu.reciprocal %96 {approx = true} : vector<8x1xf32> -> vector<8x1xf32>
    %98 = vector.broadcast %97 : vector<8x1xf32> to vector<8x8xf32>
    %99 = arith.mulf %94, %98 : vector<8x8xf32>
    %cst_35 = arith.constant dense<0.000000e+00> : vector<8x8xf32>
    %100 = tpu.matmul %99, %88, %cst_35 {dimension_numbers = #tpu.dot_dimension_numbers<[1], [0], [0], [1], [0, 0, 1, 1], [], []>} : vector<8x8xf32>, vector<8x8xf32>, vector<8x8xf32> -> vector<8x8xf32>
    %c8_36 = arith.constant 8 : index
    %c8_37 = arith.constant 8 : index
    %101 = vector.load %arg6[%c8_36, %c8_37] : memref<16x32xf32, #tpu.memory_space<vmem>>, vector<8x8xf32>
    tpu.vector_store %arg6[%c8_36, %c8_37], %100 {strides = array<i32>} : memref<16x32xf32, #tpu.memory_space<vmem>>, vector<8x8xf32>,
    %102 = vector.extract_strided_slice %5 {offsets = [8, 16], sizes = [8, 8], strides = [1, 1]} : vector<16x128xf32> to vector<8x8xf32>
    %103 = vector.extract_strided_slice %5 {offsets = [8, 48], sizes = [8, 8], strides = [1, 1]} : vector<16x128xf32> to vector<8x8xf32>
    %104 = vector.extract_strided_slice %5 {offsets = [8, 80], sizes = [8, 8], strides = [1, 1]} : vector<16x128xf32> to vector<8x8xf32>
    %cst_38 = arith.constant dense<0.000000e+00> : vector<8x8xf32>
    %105 = tpu.matmul %102, %103, %cst_38 {dimension_numbers = #tpu.dot_dimension_numbers<[1], [1], [0], [0], [0, 0, 1, 0], [], []>} : vector<8x8xf32>, vector<8x8xf32>, vector<8x8xf32> -> vector<8x8xf32>
    %cst_39 = arith.constant dense<0xFF800000> : vector<8xf32>
    %106 = vector.multi_reduction <maximumf>, %105, %cst_39 [1] : vector<8x8xf32> to vector<8xf32>
    %107 = vector.shape_cast %106 : vector<8xf32> to vector<8x1xf32>
    %108 = vector.broadcast %107 : vector<8x1xf32> to vector<8x8xf32>
    %109 = arith.subf %105, %108 : vector<8x8xf32>
    %110 = math.exp %109 : vector<8x8xf32>
    %cst_40 = arith.constant dense<0.000000e+00> : vector<8xf32>
    %111 = vector.multi_reduction <add>, %110, %cst_40 [1] : vector<8x8xf32> to vector<8xf32>
    %112 = vector.shape_cast %111 : vector<8xf32> to vector<8x1xf32>
    %113 = tpu.reciprocal %112 {approx = true} : vector<8x1xf32> -> vector<8x1xf32>
    %114 = vector.broadcast %113 : vector<8x1xf32> to vector<8x8xf32>
    %115 = arith.mulf %110, %114 : vector<8x8xf32>
    %cst_41 = arith.constant dense<0.000000e+00> : vector<8x8xf32>
    %116 = tpu.matmul %115, %104, %cst_41 {dimension_numbers = #tpu.dot_dimension_numbers<[1], [0], [0], [1], [0, 0, 1, 1], [], []>} : vector<8x8xf32>, vector<8x8xf32>, vector<8x8xf32> -> vector<8x8xf32>
    %c8_42 = arith.constant 8 : index
    %c16_43 = arith.constant 16 : index
    %117 = vector.load %arg6[%c8_42, %c16_43] : memref<16x32xf32, #tpu.memory_space<vmem>>, vector<8x8xf32>
    tpu.vector_store %arg6[%c8_42, %c16_43], %116 {strides = array<i32>} : memref<16x32xf32, #tpu.memory_space<vmem>>, vector<8x8xf32>,
    %118 = vector.extract_strided_slice %5 {offsets = [8, 24], sizes = [8, 8], strides = [1, 1]} : vector<16x128xf32> to vector<8x8xf32>
    %119 = vector.extract_strided_slice %5 {offsets = [8, 56], sizes = [8, 8], strides = [1, 1]} : vector<16x128xf32> to vector<8x8xf32>
    %120 = vector.extract_strided_slice %5 {offsets = [8, 88], sizes = [8, 8], strides = [1, 1]} : vector<16x128xf32> to vector<8x8xf32>
    %cst_44 = arith.constant dense<0.000000e+00> : vector<8x8xf32>
    %121 = tpu.matmul %118, %119, %cst_44 {dimension_numbers = #tpu.dot_dimension_numbers<[1], [1], [0], [0], [0, 0, 1, 0], [], []>} : vector<8x8xf32>, vector<8x8xf32>, vector<8x8xf32> -> vector<8x8xf32>
    %cst_45 = arith.constant dense<0xFF800000> : vector<8xf32>
    %122 = vector.multi_reduction <maximumf>, %121, %cst_45 [1] : vector<8x8xf32> to vector<8xf32>
    %123 = vector.shape_cast %122 : vector<8xf32> to vector<8x1xf32>
    %124 = vector.broadcast %123 : vector<8x1xf32> to vector<8x8xf32>
    %125 = arith.subf %121, %124 : vector<8x8xf32>
    %126 = math.exp %125 : vector<8x8xf32>
    %cst_46 = arith.constant dense<0.000000e+00> : vector<8xf32>
    %127 = vector.multi_reduction <add>, %126, %cst_46 [1] : vector<8x8xf32> to vector<8xf32>
    %128 = vector.shape_cast %127 : vector<8xf32> to vector<8x1xf32>
    %129 = tpu.reciprocal %128 {approx = true} : vector<8x1xf32> -> vector<8x1xf32>
    %130 = vector.broadcast %129 : vector<8x1xf32> to vector<8x8xf32>
    %131 = arith.mulf %126, %130 : vector<8x8xf32>
    %cst_47 = arith.constant dense<0.000000e+00> : vector<8x8xf32>
    %132 = tpu.matmul %131, %120, %cst_47 {dimension_numbers = #tpu.dot_dimension_numbers<[1], [0], [0], [1], [0, 0, 1, 1], [], []>} : vector<8x8xf32>, vector<8x8xf32>, vector<8x8xf32> -> vector<8x8xf32>
    %c8_48 = arith.constant 8 : index
    %c24_49 = arith.constant 24 : index
    %133 = vector.load %arg6[%c8_48, %c24_49] : memref<16x32xf32, #tpu.memory_space<vmem>>, vector<8x8xf32>
    tpu.vector_store %arg6[%c8_48, %c24_49], %132 {strides = array<i32>} : memref<16x32xf32, #tpu.memory_space<vmem>>, vector<8x8xf32>,
    %134 = vector.extract_strided_slice %5 {offsets = [0, 96], sizes = [16, 32], strides = [1, 1]} : vector<16x128xf32> to vector<16x32xf32>
    %c0_50 = arith.constant 0 : index
    %c0_51 = arith.constant 0 : index
    %135 = vector.load %arg6[%c0_50, %c0_51] : memref<16x32xf32, #tpu.memory_space<vmem>>, vector<16x32xf32>
    %136 = arith.addf %135, %134 : vector<16x32xf32>
    %cst_52 = arith.constant 0.000000e+00 : f32
    %137 = vector.broadcast %cst_52 : f32 to vector<16x32xf32>
    %138 = arith.maximumf %136, %137 : vector<16x32xf32>
    %cst_53 = arith.constant dense<0.000000e+00> : vector<16xf32>
    %139 = vector.multi_reduction <add>, %138, %cst_53 [1] : vector<16x32xf32> to vector<16xf32>
    %140 = vector.shape_cast %139 : vector<16xf32> to vector<16x1xf32>
    %cst_54 = arith.constant 3.200000e+01 : f32
    %141 = vector.broadcast %cst_54 : f32 to vector<16x1xf32>
    %142 = arith.divf %140, %141 : vector<16x1xf32>
    %143 = vector.broadcast %142 : vector<16x1xf32> to vector<16x32xf32>
    %144 = arith.subf %138, %143 : vector<16x32xf32>
    %145 = arith.mulf %144, %144 : vector<16x32xf32>
    %cst_55 = arith.constant dense<0.000000e+00> : vector<16xf32>
    %146 = vector.multi_reduction <add>, %145, %cst_55 [1] : vector<16x32xf32> to vector<16xf32>
    %147 = vector.shape_cast %146 : vector<16xf32> to vector<16x1xf32>
    %cst_56 = arith.constant 3.200000e+01 : f32
    %148 = vector.broadcast %cst_56 : f32 to vector<16x1xf32>
    %149 = arith.divf %147, %148 : vector<16x1xf32>
    %150 = vector.broadcast %142 : vector<16x1xf32> to vector<16x32xf32>
    %151 = arith.subf %138, %150 : vector<16x32xf32>
    %cst_57 = arith.constant 9.99999996E-13 : f32
    %152 = vector.broadcast %cst_57 : f32 to vector<16x1xf32>
    %153 = arith.addf %149, %152 : vector<16x1xf32>
    %154 = math.rsqrt %153 : vector<16x1xf32>
    %155 = vector.broadcast %154 : vector<16x1xf32> to vector<16x32xf32>
    %156 = arith.mulf %151, %155 : vector<16x32xf32>
    %c0_58 = arith.constant 0 : index
    %c0_59 = arith.constant 0 : index
    %157 = vector.load %arg3[%c0_58, %c0_59] : memref<1x32xf32, #tpu.memory_space<vmem>>, vector<1x32xf32>
    %158 = vector.broadcast %157 : vector<1x32xf32> to vector<16x32xf32>
    %159 = arith.mulf %156, %158 : vector<16x32xf32>
    %c0_60 = arith.constant 0 : index
    %c0_61 = arith.constant 0 : index
    %160 = vector.load %arg4[%c0_60, %c0_61] : memref<1x32xf32, #tpu.memory_space<vmem>>, vector<1x32xf32>
    %161 = vector.broadcast %160 : vector<1x32xf32> to vector<16x32xf32>
    %162 = arith.addf %159, %161 : vector<16x32xf32>
    %c0_62 = arith.constant 0 : index
    %c0_63 = arith.constant 0 : index
    %163 = vector.load %arg5[%c0_62, %c0_63] : memref<16x32xf32, #tpu.memory_space<vmem>>, vector<16x32xf32>
    tpu.vector_store %arg5[%c0_62, %c0_63], %162 {strides = array<i32>} : memref<16x32xf32, #tpu.memory_space<vmem>>, vector<16x32xf32>,
    return
  }
}

</mosaic_0001>

<bundles_post_ra>
// kernel: bert_attention.1
= control target key start
LH: loop header
LB: loop body
LE: loop exit
PB: predicated region body
PF: predicated region fallthrough
CT: control target
= control target key end

     0   :  { %10 = vsyncpa [#allocation4], 0  ;;  %s1096_s0 = inlined_call_operand.hbm [shape: f32[16,32], index: 0, kind: input, shape index: {}]   ;;  %s1097_s1 = inlined_call_operand.hbm [shape: f32[32,128], index: 1, kind: input, shape index: {}]   ;;  %s1098_s2 = inlined_call_operand.vmem [shape: f32[1,128], index: 2, kind: input, shape index: {}]   ;;  %s1099_s3 = inlined_call_operand.vmem [shape: f32[1,32], index: 3, kind: input, shape index: {}]   ;;  %s1100_s4 = inlined_call_operand.vmem [shape: f32[1,32], index: 4, kind: input, shape index: {}]   ;;  %s1101_s5 = inlined_call_operand.hbm [shape: f32[16,32], index: 5, kind: output, shape index: {}]  }
   0x1   :  { %11 = vsyncpa [#allocation7], 0 }
   0x2   :  { %12 = vsyncpa [#allocation5], 0  ;;  %s17_s20 = sshll.u32 %s1096_s0, 4  ;;  %s909_s21 = smov [#allocation3]   ;;  %s18_s20 = int_to_ptr.hbm [resolvable:$true] %s17_s20 }
   0x3   :  { %s19_s22 = sshll.u32 %s909_s21, 4  ;;  %s30_s25 = sshll.u32 %s1097_s1, 4  ;;  %s20_s22 = int_to_ptr.vmem [resolvable:$true] %s19_s22  ;;  %s31_s25 = int_to_ptr.hbm [resolvable:$true] %s30_s25 }
   0x4   :  { %s910_s26 = smov 128   ;;  %s911_s27 = smov 8  }
   0x5   :  { %25 = dma.hbm_to_vmem [thread:$0]  %s18_s20, 256, %s20_s22, [#allocation4], %s910_s26, %s910_s26, %s911_s27  }
   0x6   :  { %s912_s28 = smov [#allocation6]  }
   0x7   :  { %s32_s29 = sshll.u32 %s912_s28, 4  ;;  %s33_s29 = int_to_ptr.vmem [resolvable:$true] %s32_s29 }
   0x8   :  { %38 = dma.hbm_to_vmem [thread:$0]  %s31_s25, 512, %s33_s29, [#allocation7], %s910_s26, %s910_s26, %s911_s27  }
   0x9   :  { %903 = dma.done.wait [#allocation4], 256  }
   0xa   :  { %904 = vsyncadd [#allocation4], 4294967040 }
   0xb   :  { %905 = dma.done.wait [#allocation7], 512  }
   0xc   :  { %906 = vsyncadd [#allocation7], 4294966784  ;;  %v58_v0 = vld [vmem:[#allocation6 + $0x18] sm:$0xff]  ;;  %v57_v1 = vld [vmem:[#allocation6 + $0x10] sm:$0xff]  ;;  %vm63_vm0 = vcmask 261120   ;;  %s913_s30 = smov 112  }
   0xd   :  { %82 = vmatpush.msra.mxu0 %v58_v0  ;;  %v56_v2 = vld [vmem:[#allocation6 + $0x8] sm:$0xff]  ;;  %v55_v3 = vld [vmem:[#allocation6] sm:$0xff]  ;;  %v53_v4 = vld [vmem:[#allocation3] sm:$0xff]  ;;  %s914_s6 = smov 120   ;;  %s915_s7 = smov 96   ;;  %vm96_vm1 = vcmask 64512  }
   0xe   :  { %v790_v5 = vld [vmem:[%s1098_s2] ss:$0 sm:$0xff]  ;;  %s916_s8 = smov 80   ;;  %s917_s2 = smov 88   ;;  %v54_v8 = vld [vmem:[#allocation3 + $0x8] sm:$0xff]  ;;  %vm228_vm2 = vcmask 130112  }
   0xf   :  { %83 = vmatpush.msra.mxu0 %v57_v1  ;;  %s918_s9 = smov 72   ;;  %s919_s10 = smov 56   ;;  %vm299_vm3 = vcmask 195712   ;;  %vm370_vm4 = vcmask 261312  }
  0x10   :  { %s920_s11 = smov 64   ;;  %s921_s12 = smov 48  }
  0x11   :  { %84 = vmatpush.msra.mxu0 %v56_v2  ;;  %s922_s13 = smov 104   ;;  %s923_s14 = smov 40  }
  0x12   :  { %s924_s15 = smov 16   ;;  %s925_s16 = smov 24  }
  0x13   :  { %85 = vmatpush.msra.mxu0 %v55_v3  ;;  %s926_s17 = smov 32   ;;  %s928_s22 = smov [#allocation8]  }
  0x14   :  { %744 = vmatmul.msk.f32.vlgmr.msra.gmra.mxu0 %vm63_vm0, %v53_v4  ;;  %s728_s23 = sshll.u32 %s928_s22, 4  ;;  %s730_s28 = sshll.u32 %s1101_s5, 4  ;;  %s729_s23 = int_to_ptr.vmem [resolvable:$true] %s728_s23  ;;  %s731_s28 = int_to_ptr.hbm [resolvable:$true] %s730_s28 }
  0x1c   :  { %745 = vmatmul.msk.f32.gmra.mxu0 %vm63_vm0, %v54_v8 }
  0x91   :  { %v87_v6 = vpop.f32.mrf.mxu0 }
  0x92   :  { %v975_v7 = vadd.f32 %v790_v5, %v87_v6 }
  0x94   :  { %230 = vrot.lane.b32.xlu2 %v975_v7, %s913_s30  ;;  %159 = vrot.lane.b32.xlu1 %v975_v7, %s914_s6 }
  0x95   :  { %94 = vrot.lane.b32.xlu0 %v975_v7, %s915_s7 }
  0x99   :  { %v90_v20 = vpop.f32.mrf.mxu0 }
  0x9a   :  { %v1002_v21 = vadd.f32 %v790_v5, %v90_v20 }
  0x9c   :  { %232 = vrot.lane.b32.xlu1 %v975_v7, %s916_s8 }
  0x9d   :  { %161 = vrot.lane.b32.xlu0 %v975_v7, %s917_s2 }
  0xa4   :  { %303 = vrot.lane.b32.xlu1 %v975_v7, %s918_s9 }
  0xee   :  { %v231_v13 = vpop.permute.xlu2 %230 }
 0x106   :  { %v160_v9 = vpop.permute.xlu1 %159 }
 0x107   :  { %v95_v10 = vpop.permute.xlu0 %94 }
 0x108   :  { %746 = vmatpush.xpose.msk.msra.mxu1 %vm96_vm1, %v95_v10 }
 0x10b   :  { %747 = vmatmul.msk.f32.vlgmr.msra.gmra.mxu1 %vm96_vm1, %v975_v7 }
 0x10e   :  { %v233_v11 = vpop.permute.xlu1 %232 }
 0x10f   :  { %v162_v12 = vpop.permute.xlu0 %161  ;;  %752 = vmatpush.xpose.msk.msrb.mxu1 %vm96_vm1, %v233_v11 }
 0x110   :  { %749 = vmatpush.xpose.msk.msra.mxu3 %vm96_vm1, %v162_v12 }
 0x113   :  { %750 = vmatmul.msk.f32.vlgmr.msra.gmra.mxu3 %vm96_vm1, %v160_v9  ;;  %753 = vmatmul.msk.f32.vlgmr.msrb.gmra.mxu1 %vm96_vm1, %v231_v13 }
 0x116   :  { %v304_v22 = vpop.permute.xlu1 %303 }
 0x188   :  { %v118_v14 = vpop.f32.mrf.mxu1 }
 0x189   :  { %v121_v15 = vsel %vm96_vm1, %v118_v14, -inf }
 0x18a   :  { %122 = vmax.xlane.f32.xlu2 %v121_v15 }
 0x190   :  { %v255_v16 = vpop.f32.mrf.mxu1 }
 0x191   :  { %v258_v17 = vsel %vm96_vm1, %v255_v16, -inf }
 0x192   :  { %259 = vmax.xlane.f32.xlu1 %v258_v17 }
 0x196   :  { %v184_v18 = vpop.f32.mrf.mxu3 }
 0x197   :  { %v187_v19 = vsel %vm96_vm1, %v184_v18, -inf }
 0x198   :  { %188 = vmax.xlane.f32.xlu0 %v187_v19 }
 0x1a2   :  { %198 = vrot.lane.b32.xlu2 %v975_v7, %s919_s10 }
 0x1aa   :  { %373 = vrot.lane.b32.xlu2 %v1002_v21, %s915_s7 }
 0x1ab   :  { %439 = vrot.lane.b32.xlu1 %v1002_v21, %s917_s2 }
 0x1ac   :  { %132 = vrot.lane.b32.xlu0 %v975_v7, %s920_s11 }
 0x1b2   :  { %509 = vrot.lane.b32.xlu2 %v1002_v21, %s916_s8 }
 0x1b4   :  { %269 = vrot.lane.b32.xlu0 %v975_v7, %s921_s12 }
 0x1bc   :  { %301 = vrot.lane.b32.xlu0 %v975_v7, %s922_s13 }
 0x1c4   :  { %437 = vrot.lane.b32.xlu0 %v1002_v21, %s914_s6 }
 0x1cc   :  { %507 = vrot.lane.b32.xlu0 %v1002_v21, %s913_s30 }
 0x1fd   :  { %v123_v23 = vpop.xlane.xlu2 %122 }
 0x1fe   :  { %v124_v24 = vsub.f32 %v118_v14, %v123_v23 }
 0x200   :  { %v125_v25 = vmul.f32 1.442695, %v124_v24 }
 0x202   :  { %793 = vpow2.f32 %v125_v25 }
 0x205   :  { %v260_v26 = vpop.xlane.xlu1 %259  ;;  %v199_v39 = vpop.permute.xlu2 %198 }
 0x206   :  { %v261_v27 = vsub.f32 %v255_v16, %v260_v26 }
 0x208   :  { %v794_v28 = vpop.eup %793  ;;  %v262_v29 = vmul.f32 1.442695, %v261_v27 }
 0x209   :  { %v127_v30 = vsel %vm96_vm1, %v794_v28, 0.0 }
 0x20a   :  { %795 = vpow2.f32 %v262_v29  ;;  %128 = vadd.xlane.f32.xlu2 %v127_v30 }
 0x20b   :  { %v189_v31 = vpop.xlane.xlu0 %188 }
 0x20c   :  { %v190_v32 = vsub.f32 %v184_v18, %v189_v31 }
 0x20d   :  { %v374_v41 = vpop.permute.xlu2 %373 }
 0x20e   :  { %v191_v33 = vmul.f32 1.442695, %v190_v32 }
 0x210   :  { %v796_v34 = vpop.eup %795  ;;  %797 = vpow2.f32 %v191_v33 }
 0x211   :  { %v264_v35 = vsel %vm96_vm1, %v796_v34, 0.0 }
 0x212   :  { %265 = vadd.xlane.f32.xlu1 %v264_v35 }
 0x215   :  { %v510_v42 = vpop.permute.xlu2 %509 }
 0x216   :  { %v798_v36 = vpop.eup %797 }
 0x217   :  { %v193_v37 = vsel %vm96_vm1, %v798_v36, 0.0 }
 0x218   :  { %194 = vadd.xlane.f32.xlu2 %v193_v37 }
 0x21d   :  { %v440_v43 = vpop.permute.xlu1 %439 }
 0x21e   :  { %v133_v38 = vpop.permute.xlu0 %132 }
 0x21f   :  { %153 = vmatpush.msra.mxu2 %v133_v38 }
 0x221   :  { %219 = vmatpush.msrb.mxu2 %v199_v39 }
 0x226   :  { %v270_v40 = vpop.permute.xlu0 %269 }
 0x227   :  { %290 = vmatpush.msrb.mxu3 %v270_v40 }
 0x229   :  { %758 = vmatpush.xpose.msk.msra.mxu3 %vm96_vm1, %v374_v41 }
 0x22b   :  { %579 = vrot.lane.b32.xlu1 %v1002_v21, %s918_s9 }
 0x22e   :  { %v302_v50 = vpop.permute.xlu0 %301 }
 0x230   :  { %577 = vrot.lane.b32.xlu2 %v1002_v21, %s922_s13 }
 0x236   :  { %v438_v54 = vpop.permute.xlu0 %437 }
 0x23e   :  { %v508_v56 = vpop.permute.xlu0 %507 }
 0x27d   :  { %v129_v44 = vpop.xlane.xlu2 %128 }
 0x27e   :  { %799 = vrcp.f32 %v129_v44 }
 0x284   :  { %v800_v45 = vpop.eup %799 }
 0x285   :  { %v266_v46 = vpop.xlane.xlu1 %265  ;;  %v131_v47 = vmul.f32 %v800_v45, %v794_v28 }
 0x286   :  { %801 = vrcp.f32 %v266_v46 }
 0x287   :  { %748 = vmatmul.msk.f32.vlgmr.msra.gmra.mxu2 %vm96_vm1, %v131_v47 }
 0x288   :  { %755 = vmatpush.xpose.msk.msra.mxu2 %vm96_vm1, %v304_v22 }
 0x28b   :  { %v195_v48 = vpop.xlane.xlu2 %194 }
 0x28c   :  { %v802_v49 = vpop.eup %801  ;;  %803 = vrcp.f32 %v195_v48 }
 0x28d   :  { %v268_v51 = vmul.f32 %v802_v49, %v796_v34 }
 0x28f   :  { %754 = vmatmul.msk.f32.vlgmr.msrb.gmra.mxu3 %vm96_vm1, %v268_v51 }
 0x290   :  { %764 = vmatpush.xpose.msk.msrb.mxu3 %vm96_vm1, %v510_v42 }
 0x292   :  { %v804_v52 = vpop.eup %803 }
 0x293   :  { %v197_v53 = vmul.f32 %v804_v52, %v798_v36  ;;  %v578_v57 = vpop.permute.xlu2 %577 }
 0x295   :  { %751 = vmatmul.msk.f32.vlgmr.msrb.gmra.mxu2 %vm96_vm1, %v197_v53 }
 0x296   :  { %761 = vmatpush.xpose.msk.msrb.mxu2 %vm96_vm1, %v440_v43 }
 0x297   :  { %759 = vmatmul.msk.f32.vlgmr.msra.gmra.mxu3 %vm96_vm1, %v1002_v21 }
 0x29d   :  { %v580_v55 = vpop.permute.xlu1 %579  ;;  %756 = vmatmul.msk.f32.vlgmr.msra.gmra.mxu2 %vm96_vm1, %v302_v50 }
 0x29e   :  { %767 = vmatpush.xpose.msk.msra.mxu2 %vm96_vm1, %v580_v55 }
 0x29f   :  { %765 = vmatmul.msk.f32.vlgmr.msrb.gmra.mxu3 %vm96_vm1, %v508_v56 }
 0x2a5   :  { %762 = vmatmul.msk.f32.vlgmr.msrb.gmra.mxu2 %vm96_vm1, %v438_v54 }
 0x2ad   :  { %768 = vmatmul.msk.f32.vlgmr.msra.gmra.mxu2 %vm96_vm1, %v578_v57 }
 0x30a   :  { %v155_v58 = vpop.f32.mrf.mxu2 }
 0x30b   :  { %158 = vst.msk [vmem:[#allocation2] sm:$0xff] %vm96_vm1, %v155_v58 }
 0x312   :  { %v292_v59 = vpop.f32.mrf.mxu3 }
 0x318   :  { %v221_v60 = vpop.f32.mrf.mxu2 }
 0x31a   :  { %v396_v61 = vpop.f32.mrf.mxu3 }
 0x31b   :  { %v399_v62 = vsel %vm96_vm1, %v396_v61, -inf }
 0x31c   :  { %400 = vmax.xlane.f32.xlu0 %v399_v62 }
 0x320   :  { %v326_v63 = vpop.f32.mrf.mxu2 }
 0x321   :  { %v329_v0 = vsel %vm96_vm1, %v326_v63, -inf }
 0x322   :  { %330 = vmax.xlane.f32.xlu1 %v329_v0  ;;  %v532_v1 = vpop.f32.mrf.mxu3 }
 0x323   :  { %v535_v4 = vsel %vm96_vm1, %v532_v1, -inf }
 0x328   :  { %v462_v2 = vpop.f32.mrf.mxu2 }
 0x329   :  { %v465_v3 = vsel %vm96_vm1, %v462_v2, -inf }
 0x32a   :  { %466 = vmax.xlane.f32.xlu2 %v465_v3  ;;  %536 = vmax.xlane.f32.xlu1 %v535_v4 }
 0x330   :  { %v602_v5 = vpop.f32.mrf.mxu2 }
 0x331   :  { %v605_v6 = vsel %vm96_vm1, %v602_v5, -inf }
 0x332   :  { %606 = vmax.xlane.f32.xlu0 %v605_v6 }
 0x342   :  { %340 = vrot.lane.b32.xlu2 %v975_v7, %s923_s14 }
 0x346   :  { %410 = vrot.lane.b32.xlu0 %v1002_v21, %s920_s11 }
 0x38f   :  { %v401_v8 = vpop.xlane.xlu0 %400 }
 0x390   :  { %v402_v9 = vsub.f32 %v396_v61, %v401_v8 }
 0x392   :  { %v403_v10 = vmul.f32 1.442695, %v402_v9 }
 0x394   :  { %805 = vpow2.f32 %v403_v10  ;;  %v927_v10 = vmov 32.0  }
 0x395   :  { %v331_v11 = vpop.xlane.xlu1 %330 }
 0x396   :  { %v332_v12 = vsub.f32 %v326_v63, %v331_v11 }
 0x398   :  { %v333_v13 = vmul.f32 1.442695, %v332_v12 }
 0x39a   :  { %v806_v14 = vpop.eup %805  ;;  %807 = vpow2.f32 %v333_v13 }
 0x39b   :  { %v405_v15 = vsel %vm96_vm1, %v806_v14, 0.0 }
 0x39c   :  { %406 = vadd.xlane.f32.xlu1 %v405_v15 }
 0x39d   :  { %v467_v16 = vpop.xlane.xlu2 %466  ;;  %v537_v17 = vpop.xlane.xlu1 %536 }
 0x39e   :  { %v468_v18 = vsub.f32 %v462_v2, %v467_v16  ;;  %v538_v19 = vsub.f32 %v532_v1, %v537_v17 }
 0x3a0   :  { %v808_v20 = vpop.eup %807  ;;  %v469_v22 = vmul.f32 1.442695, %v468_v18  ;;  %v539_v23 = vmul.f32 1.442695, %v538_v19 }
 0x3a1   :  { %v335_v24 = vsel %vm96_vm1, %v808_v20, 0.0 }
 0x3a2   :  { %809 = vpow2.f32 %v469_v22  ;;  %336 = vadd.xlane.f32.xlu2 %v335_v24 }
 0x3a3   :  { %811 = vpow2.f32 %v539_v23 }
 0x3a5   :  { %v341_v25 = vpop.permute.xlu2 %340  ;;  %v607_v26 = vpop.xlane.xlu0 %606 }
 0x3a6   :  { %v608_v27 = vsub.f32 %v602_v5, %v607_v26  ;;  %361 = vmatpush.msra.mxu1 %v341_v25 }
 0x3a8   :  { %v810_v28 = vpop.eup %809  ;;  %v609_v29 = vmul.f32 1.442695, %v608_v27 }
 0x3a9   :  { %v812_v30 = vpop.eup %811  ;;  %v471_v31 = vsel %vm96_vm1, %v810_v28, 0.0 }
 0x3aa   :  { %813 = vpow2.f32 %v609_v29  ;;  %472 = vadd.xlane.f32.xlu0 %v471_v31  ;;  %v541_v32 = vsel %vm96_vm1, %v812_v30, 0.0 }
 0x3ab   :  { %542 = vadd.xlane.f32.xlu1 %v541_v32 }
 0x3b0   :  { %v814_v33 = vpop.eup %813 }
 0x3b1   :  { %v611_v34 = vsel %vm96_vm1, %v814_v33, 0.0 }
 0x3b3   :  { %612 = vadd.xlane.f32.xlu1 %v611_v34 }
 0x3b8   :  { %v411_v35 = vpop.permute.xlu0 %410 }
 0x3b9   :  { %431 = vmatpush.msrb.mxu0 %v411_v35 }
 0x3ba   :  { %546 = vrot.lane.b32.xlu2 %v1002_v21, %s921_s12 }
 0x3be   :  { %616 = vrot.lane.b32.xlu0 %v1002_v21, %s923_s14 }
 0x3c2   :  { %225 = vrot.lane.b32.xlu2 %v221_v60, %s911_s27 }
 0x3ca   :  { %296 = vrot.lane.b32.xlu2 %v292_v59, %s924_s15 }
 0x3cc   :  { %476 = vrot.lane.b32.xlu1 %v1002_v21, %s919_s10 }
 0x40f   :  { %v407_v36 = vpop.xlane.xlu1 %406 }
 0x410   :  { %815 = vrcp.f32 %v407_v36 }
 0x415   :  { %v337_v37 = vpop.xlane.xlu2 %336 }
 0x416   :  { %v816_v38 = vpop.eup %815  ;;  %817 = vrcp.f32 %v337_v37 }
 0x417   :  { %v409_v39 = vmul.f32 %v816_v38, %v806_v14 }
 0x419   :  { %760 = vmatmul.msk.f32.vlgmr.msrb.gmra.mxu0 %vm96_vm1, %v409_v39 }
 0x41c   :  { %v818_v40 = vpop.eup %817 }
 0x41d   :  { %v339_v41 = vmul.f32 %v818_v40, %v808_v20  ;;  %v547_v42 = vpop.permute.xlu2 %546  ;;  %v473_v48 = vpop.xlane.xlu0 %472 }
 0x41e   :  { %v543_v43 = vpop.xlane.xlu1 %542  ;;  %567 = vmatpush.msra.mxu0 %v547_v42 }
 0x41f   :  { %819 = vrcp.f32 %v543_v43  ;;  %757 = vmatmul.msk.f32.vlgmr.msra.gmra.mxu1 %vm96_vm1, %v339_v41 }
 0x420   :  { %821 = vrcp.f32 %v473_v48 }
 0x425   :  { %v820_v44 = vpop.eup %819  ;;  %v226_v45 = vpop.permute.xlu2 %225 }
 0x426   :  { %v545_v46 = vmul.f32 %v820_v44, %v812_v30  ;;  %229 = vst.msk [vmem:[#allocation2] sm:$0xff] %vm228_vm2, %v226_v45  ;;  %v613_v49 = vpop.xlane.xlu1 %612  ;;  %v822_v50 = vpop.eup %821  ;;  %v791_v45 = vld [vmem:[%s1099_s3] ss:$0 sm:$0xff] }
 0x427   :  { %823 = vrcp.f32 %v613_v49  ;;  %v475_v51 = vmul.f32 %v822_v50, %v810_v28  ;;  %v792_v50 = vld [vmem:[%s1100_s4] ss:$0 sm:$0xff] }
 0x428   :  { %766 = vmatmul.msk.f32.vlgmr.msra.gmra.mxu0 %vm96_vm1, %v545_v46  ;;  %825 = vrcp.f32 %v927_v10 }
 0x42d   :  { %v297_v47 = vpop.permute.xlu2 %296  ;;  %v824_v54 = vpop.eup %823 }
 0x42e   :  { %300 = vst.msk [vmem:[#allocation2] sm:$0xff] %vm299_vm3, %v297_v47  ;;  %v615_v55 = vmul.f32 %v824_v54, %v814_v33  ;;  %v826_v11 = vpop.eup %825 }
 0x42f   :  { %v666_v12 = vmul.f32 32.0, %v826_v11  ;;  %vm670_vm5 = vweird.f32 %v826_v11 }
 0x430   :  { %v617_v53 = vpop.permute.xlu0 %616 }
 0x431   :  { %v667_v13 = vsub.f32 1.0, %v666_v12 }
 0x433   :  { %v668_v14 = vmul.f32 %v826_v11, %v667_v13 }
 0x435   :  { %v669_v15 = vadd.f32 %v826_v11, %v668_v14 }
 0x437   :  { %v671_v16 = vsel %vm670_vm5, %v826_v11, %v669_v15 }
 0x43e   :  { %v477_v52 = vpop.permute.xlu1 %476 }
 0x43f   :  { %497 = vmatpush.msrb.mxu1 %v477_v52 }
 0x440   :  { %763 = vmatmul.msk.f32.vlgmr.msrb.gmra.mxu1 %vm96_vm1, %v475_v51 }
 0x441   :  { %637 = vmatpush.msra.mxu1 %v617_v53 }
 0x448   :  { %769 = vmatmul.msk.f32.vlgmr.msra.gmra.mxu1 %vm96_vm1, %v615_v55 }
 0x496   :  { %v433_v56 = vpop.f32.mrf.mxu0 }
 0x497   :  { %436 = vst.msk [vmem:[#allocation2 + $0x8] sm:$0xff] %vm96_vm1, %v433_v56 }
 0x49c   :  { %v363_v57 = vpop.f32.mrf.mxu1 }
 0x49d   :  { %367 = vrot.lane.b32.xlu1 %v363_v57, %s925_s16 }
 0x4a5   :  { %651 = vrot.lane.b32.xlu1 %v1002_v21, %s926_s17  ;;  %v569_v59 = vpop.f32.mrf.mxu0 }
 0x4bd   :  { %v499_v58 = vpop.f32.mrf.mxu1 }
 0x4be   :  { %503 = vrot.lane.b32.xlu0 %v499_v58, %s911_s27 }
 0x4c5   :  { %v639_v60 = vpop.f32.mrf.mxu1 }
 0x4c6   :  { %573 = vrot.lane.b32.xlu0 %v569_v59, %s924_s15  ;;  %643 = vrot.lane.b32.xlu2 %v639_v60, %s925_s16 }
 0x4ce   :  { %649 = vrot.lane.b32.xlu0 %v975_v7, %s926_s17 }
 0x50f   :  { %v368_v61 = vpop.permute.xlu1 %367 }
 0x510   :  { %371 = vst.msk [vmem:[#allocation2] sm:$0xff] %vm370_vm4, %v368_v61 }
 0x517   :  { %v647_v21 = vld [vmem:[#allocation2] sm:$0xff]  ;;  %v652_v2 = vpop.permute.xlu1 %651 }
 0x520   :  { %v644_v0 = vpop.permute.xlu2 %643 }
 0x530   :  { %v504_v62 = vpop.permute.xlu0 %503 }
 0x531   :  { %506 = vst.msk [vmem:[#allocation2 + $0x8] sm:$0xff] %vm228_vm2, %v504_v62 }
 0x538   :  { %v574_v63 = vpop.permute.xlu0 %573 }
 0x539   :  { %576 = vst.msk [vmem:[#allocation2 + $0x8] sm:$0xff] %vm299_vm3, %v574_v63 }
 0x53a   :  { %646 = vst.msk [vmem:[#allocation2 + $0x8] sm:$0xff] %vm370_vm4, %v644_v0 }
 0x540   :  { %v650_v1 = vpop.permute.xlu0 %649 }
 0x541   :  { %v655_v3 = vadd.f32 %v650_v1, %v647_v21  ;;  %v648_v4 = vld [vmem:[#allocation2 + $0x8] sm:$0xff] }
 0x542   :  { %v656_v5 = vadd.f32 %v652_v2, %v648_v4 }
 0x543   :  { %v657_v6 = vmax.f32 %v655_v3, 0.0 }
 0x544   :  { %v658_v8 = vmax.f32 %v656_v5, 0.0 }
 0x545   :  { %v659_v7 = vsel %vm63_vm0, %v657_v6, 0.0 }
 0x546   :  { %660 = vadd.xlane.f32.xlu2 %v659_v7  ;;  %v662_v9 = vsel %vm63_vm0, %v658_v8, 0.0 }
 0x547   :  { %663 = vadd.xlane.f32.xlu0 %v662_v9 }
 0x5b9   :  { %v661_v17 = vpop.xlane.xlu2 %660 }
 0x5ba   :  { %v672_v18 = vmul.f32 %v671_v16, %v661_v17  ;;  %v664_v19 = vpop.xlane.xlu0 %663 }
 0x5bb   :  { %v673_v20 = vmul.f32 %v671_v16, %v664_v19 }
 0x5bc   :  { %v674_v22 = vsub.f32 %v657_v6, %v672_v18 }
 0x5bd   :  { %v675_v23 = vsub.f32 %v658_v8, %v673_v20 }
 0x5be   :  { %v676_v24 = vmul.f32 %v674_v22, %v674_v22 }
 0x5bf   :  { %v677_v25 = vmul.f32 %v675_v23, %v675_v23 }
 0x5c0   :  { %v678_v26 = vsel %vm63_vm0, %v676_v24, 0.0 }
 0x5c1   :  { %679 = vadd.xlane.f32.xlu1 %v678_v26  ;;  %v681_v27 = vsel %vm63_vm0, %v677_v25, 0.0 }
 0x5c2   :  { %682 = vadd.xlane.f32.xlu2 %v681_v27 }
 0x634   :  { %v680_v28 = vpop.xlane.xlu1 %679 }
 0x635   :  { %v684_v29 = vmul.f32 %v680_v28, %v671_v16  ;;  %v683_v30 = vpop.xlane.xlu2 %682 }
 0x636   :  { %v685_v31 = vmul.f32 %v683_v30, %v671_v16 }
 0x637   :  { %v686_v32 = vadd.f32 1e-12, %v684_v29 }
 0x638   :  { %v687_v33 = vadd.f32 1e-12, %v685_v31 }
 0x639   :  { %827 = vrsqrt.f32 %v686_v32  ;;  %vm694_vm8 = vweird.f32 %v686_v32 }
 0x63a   :  { %829 = vrsqrt.f32 %v687_v33  ;;  %vm704_vm10 = vweird.f32 %v687_v33 }
 0x63f   :  { %v828_v34 = vpop.eup %827 }
 0x640   :  { %v830_v35 = vpop.eup %829  ;;  %v689_v36 = vmul.f32 %v828_v34, %v686_v32  ;;  %vm695_vm6 = vweird.f32 %v828_v34 }
 0x641   :  { %v699_v37 = vmul.f32 %v830_v35, %v687_v33  ;;  %vm705_vm7 = vweird.f32 %v830_v35  ;;  %vm696_vm9 = vmor %vm694_vm8, %vm695_vm6 }
 0x642   :  { %v690_v38 = vmul.f32 %v828_v34, %v689_v36  ;;  %vm706_vm11 = vmor %vm704_vm10, %vm705_vm7 }
 0x643   :  { %v700_v39 = vmul.f32 %v830_v35, %v699_v37 }
 0x644   :  { %v691_v40 = vmul.f32 0.5, %v690_v38 }
 0x645   :  { %v701_v41 = vmul.f32 0.5, %v700_v39 }
 0x646   :  { %v692_v42 = vsub.f32 1.5, %v691_v40 }
 0x647   :  { %v702_v43 = vsub.f32 1.5, %v701_v41 }
 0x648   :  { %v693_v44 = vmul.f32 %v828_v34, %v692_v42 }
 0x649   :  { %v703_v46 = vmul.f32 %v830_v35, %v702_v43 }
 0x64a   :  { %v697_v47 = vsel %vm696_vm9, %v828_v34, %v693_v44 }
 0x64b   :  { %v708_v48 = vmul.f32 %v697_v47, %v674_v22  ;;  %v707_v49 = vsel %vm706_vm11, %v830_v35, %v703_v46 }
 0x64c   :  { %v709_v51 = vmul.f32 %v707_v49, %v675_v23 }
 0x64d   :  { %v714_v52 = vmul.f32 %v791_v45, %v708_v48 }
 0x64e   :  { %v715_v53 = vmul.f32 %v791_v45, %v709_v51 }
 0x64f   :  { %v720_v54 = vadd.f32 %v792_v50, %v714_v52 }
 0x650   :  { %v721_v55 = vadd.f32 %v792_v50, %v715_v53 }
 0x651   :  { %722 = vst.msk [vmem:[#allocation8] sm:$0xff] %vm63_vm0, %v720_v54 }
 0x652   :  { %723 = vst.msk [vmem:[#allocation8 + $0x8] sm:$0xff] %vm63_vm0, %v721_v55 }
 0x653   :  { %736 = dma.vmem_to_hbm [thread:$0]  %s729_s23, 256, %s731_s28, [#allocation5], %s910_s26, %s910_s26, %s911_s27  }
 0x654   :  { %907 = dma.done.wait [#allocation5], 256  }
 0x655   :  { %908 = vsyncadd [#allocation5], 4294967040 }
 0x656   :  { %741 = vsyncpa [#allocation4], 1 }
 0x657   :  { %742 = vsyncpa [#allocation7], 1 }
 0x658   :  { %743 = vsyncpa [#allocation5], 1 }

</bundles_post_ra>
